<compile_context>
chip_gen: v6e
topology: v6e:2x2x1
jax: 0.10.0
libtpu: 0.0.40
codegen_flags: <defaults>
</compile_context>

<pallas_src>
import functools

import jax
import jax.numpy as jnp
from jax.experimental import pallas as pl
from jax.experimental.pallas import tpu as pltpu

LANE = 128


def _round_up(x, m):
    return ((x + m - 1) // m) * m


def _pick_batch_block(batch, cap=8):
    for bb in range(min(batch, cap), 0, -1):
        if batch % bb == 0:
            return bb
    return 1


def _default_act_dtype():
    # bf16 activation math only on chips with bf16 VPU/EUP (v6e, v7x);
    # v5e (f32-only VPU/EUP), older gens and non-TPU backends keep f32.
    try:
        kind = jax.devices()[0].device_kind.lower()
    except Exception:
        return jnp.float32
    return jnp.bfloat16 if ("v6" in kind or "v7" in kind) else jnp.float32


def _silu(y):
    # Exact SiLU with a single EUP op: sigmoid(y) = 0.5 * (1 + tanh(y/2)).
    return y * (0.5 + 0.5 * jnp.tanh(0.5 * y))


# ---------------------------------------------------------------------------
# Fused kernel: stem matmul + SiLU -> head matmul + SiLU -> global-avg-pool
# accumulation -> Linear classifier (finalized on the last row-tile).
# ---------------------------------------------------------------------------
def _fused_backbone_head_kernel(hw, act_dtype, cols_ref, ws_ref, bs_ref,
                                wh_ref, bh_ref, wc_ref, bc_ref, o_ref,
                                pooled_acc):
    r = pl.program_id(1)
    n_r = pl.num_programs(1)
    bb, tile_r, k = cols_ref.shape
    f = wh_ref.shape[1]

    @pl.when(r == 0)
    def _():
        pooled_acc[...] = jnp.zeros_like(pooled_acc)

    # Fold the batch block into the matmul rows (free reshape: tile_r % 16 == 0).
    cols = cols_ref[...].reshape(bb * tile_r, k)            # bf16

    # Conv stem (matmul over im2col taps); BN scale already folded into ws.
    y = jnp.dot(cols, ws_ref[...],
                preferred_element_type=jnp.float32) + bs_ref[...]
    stem = _silu(y.astype(act_dtype))                        # bf16 on v6e/v7x

    # 1x1 head conv; intermediate never leaves VMEM. Keep f32 for exact pooling.
    z = jnp.dot(stem.astype(wh_ref.dtype), wh_ref[...],
                preferred_element_type=jnp.float32) + bh_ref[...]
    head = _silu(z)                                          # (bb*tile_r, F) f32

    head3 = head.reshape(bb, tile_r, f)

    def accumulate(h3):
        # VPU-only partial pooling: sum tile_r rows down to 8 sublanes per image;
        # the cross-sublane (XLU) 8 -> 1 reduction happens once at finalize.
        pooled_acc[...] += h3.reshape(bb, tile_r // 8, 8, f).sum(axis=1)

    if hw % tile_r == 0:
        accumulate(head3)
    else:
        # Only the last row-tile contains padded rows; mask only there.
        @pl.when(r < n_r - 1)
        def _():
            accumulate(head3)

        @pl.when(r == n_r - 1)
        def _():
            rows = r * tile_r + jax.lax.broadcasted_iota(
                jnp.int32, (1, tile_r, 1), 1)
            accumulate(jnp.where(rows < hw, head3, 0.0))

    # Last row-tile of this batch group: finish the mean + Linear classifier.
    @pl.when(r == n_r - 1)
    def _():
        pooled = pooled_acc[...].sum(axis=1) * (1.0 / hw)    # (bb, F) f32
        logits = jnp.dot(pooled.astype(wc_ref.dtype), wc_ref[...],
                         preferred_element_type=jnp.float32) + bc_ref[...]
        o_ref[...] = logits[None].astype(o_ref.dtype)        # (1, bb, NP)


def fused_forward(cols, w_stem, b_stem, w_head, b_head, w_cls, b_cls,
                  *, hw, tile_r, batch_block, act_dtype):
    B, hw_pad, K = cols.shape
    S = w_stem.shape[1]
    F = w_head.shape[1]
    NP = w_cls.shape[1]
    Bb = batch_block
    G = B // Bb
    n_r = hw_pad // tile_r

    operands = (cols, w_stem, b_stem, w_head, b_head, w_cls, b_cls)
    cost = pl.CostEstimate(
        flops=int(2 * B * hw_pad * (K * S + S * F) + 2 * B * F * NP),
        transcendentals=int(B * hw_pad * (S + F)),
        bytes_accessed=int(sum(a.size * a.dtype.itemsize for a in operands)
                           + G * Bb * NP * 4),
    )

    kernel = functools.partial(_fused_backbone_head_kernel, hw, act_dtype)
    # NOTE: correctness of the pooled_acc scratch accumulator relies on the
    # row-tile axis being the LAST grid axis and sequential ("arbitrary").
    out = pl.pallas_call(
        kernel,
        out_shape=jax.ShapeDtypeStruct((G, Bb, NP), jnp.float32),
        grid_spec=pltpu.PrefetchScalarGridSpec(
            num_scalar_prefetch=0,
            grid=(G, n_r),                                   # reduction axis last
            in_specs=[
                pl.BlockSpec((Bb, tile_r, K), lambda g, r: (g, r, 0)),
                # Grid-invariant (resident) weights / biases.
                # TODO(synk): on v7x, pipeline_mode=pl.Buffered(1) on these
                #             constant-index specs halves their VMEM footprint.
                pl.BlockSpec((K, S), lambda g, r: (0, 0)),
                pl.BlockSpec((1, S), lambda g, r: (0, 0)),
                pl.BlockSpec((S, F), lambda g, r: (0, 0)),
                pl.BlockSpec((1, F), lambda g, r: (0, 0)),
                pl.BlockSpec((F, NP), lambda g, r: (0, 0)),
                pl.BlockSpec((1, NP), lambda g, r: (0, 0)),
            ],
            out_specs=pl.BlockSpec((1, Bb, NP), lambda g, r: (g, 0, 0)),
            scratch_shapes=[pltpu.VMEM((Bb, 8, F), jnp.float32)],
        ),
        compiler_params=pltpu.CompilerParams(
            dimension_semantics=("parallel", "arbitrary"),
            vmem_limit_bytes=32 * 1024 * 1024,   # safe on v5e/v6e/v7x budgets
        ),
        cost_estimate=cost,
    )(*operands)
    return out.reshape(B, NP)


# ---------------------------------------------------------------------------
# Glue: im2col for the 3x3 stride-2 pad-1 conv stem (pure reshuffle, no compute)
# ---------------------------------------------------------------------------
def im2col_3x3_s2(x_nhwc):
    B, H, W, C = x_nhwc.shape
    Ho, Wo = H // 2, W // 2
    xp = jnp.pad(x_nhwc, ((0, 0), (1, 1), (1, 1), (0, 0)))
    taps = [xp[:, dh:dh + 2 * Ho:2, dw:dw + 2 * Wo:2, :]
            for dh in range(3) for dw in range(3)]
    cols = jnp.concatenate(taps, axis=-1)                   # (B, Ho, Wo, 9C)
    return cols.reshape(B, Ho * Wo, 9 * C), Ho, Wo


# ---------------------------------------------------------------------------
# Full NetModel forward (eval mode)
# ---------------------------------------------------------------------------
def net_model_forward(x_nchw, params, *, tile_r_max=256, batch_block_max=8,
                      act_dtype=None):
    if act_dtype is None:
        act_dtype = _default_act_dtype()

    x = jnp.transpose(x_nchw, (0, 2, 3, 1)).astype(jnp.bfloat16)   # NCHW -> NHWC
    cols, Ho, Wo = im2col_3x3_s2(x)
    hw = Ho * Wo
    B = cols.shape[0]

    # Row tiling: multiples of 16 (bf16 sublane packing); tile_r_max=256 keeps
    # double-buffered cols + f32 intermediates well inside v7x's 64 MiB VMEM.
    tile_r = min(_round_up(tile_r_max, 16), _round_up(hw, 16))
    hw_pad = _round_up(hw, tile_r)
    if hw_pad != hw:
        cols = jnp.pad(cols, ((0, 0), (0, hw_pad - hw), (0, 0)))

    batch_block = _pick_batch_block(B, batch_block_max)

    logits_padded = fused_forward(
        cols, params["w_stem"], params["b_stem"],
        params["w_head"], params["b_head"],
        params["w_cls"], params["b_cls"],
        hw=hw, tile_r=tile_r, batch_block=batch_block, act_dtype=act_dtype)
    return logits_padded[:, :params["n_classes"]]


def init_params(key, *, in_channels, stem_ch, feat_dim, n_classes):
    k = jax.random.split(key, 8)
    n_pad = _round_up(max(n_classes, 1), LANE)

    w_stem = 0.1 * jax.random.normal(k[0], (9 * in_channels, stem_ch), jnp.float32)
    stem_scale = 1.0 + 0.05 * jax.random.normal(k[1], (1, stem_ch), jnp.float32)
    b_stem = 0.01 * jax.random.normal(k[2], (1, stem_ch), jnp.float32)
    w_head = 0.1 * jax.random.normal(k[3], (stem_ch, feat_dim), jnp.float32)
    head_scale = 1.0 + 0.05 * jax.random.normal(k[4], (1, feat_dim), jnp.float32)
    b_head = 0.01 * jax.random.normal(k[5], (1, feat_dim), jnp.float32)
    w_cls = 0.1 * jax.random.normal(k[6], (feat_dim, n_classes), jnp.float32)
    b_cls = 0.01 * jax.random.normal(k[7], (1, n_classes), jnp.float32)

    # Fold BN scale into the weights once at init: (X@W)*s + b == X@(W*diag(s)) + b
    w_stem = w_stem * stem_scale
    w_head = w_head * head_scale

    # Pad classifier to a lane-dense (F, 128k) output; extra columns are zero.
    w_cls = jnp.pad(w_cls, ((0, 0), (0, n_pad - n_classes)))
    b_cls = jnp.pad(b_cls, ((0, 0), (0, n_pad - n_classes)))

    return {
        "w_stem": w_stem.astype(jnp.bfloat16),
        "b_stem": b_stem,
        "w_head": w_head.astype(jnp.bfloat16),
        "b_head": b_head,
        "w_cls": w_cls.astype(jnp.bfloat16),
        "b_cls": b_cls,
        "n_classes": n_classes,
    }


if __name__ == "__main__":
    # in_channels=1 (conv_stem weights averaged to 1 input channel in the spec).
    # stem_ch=256 gives a 256-deep head contraction (fills v6e/v7x MXU).
    B, C_in, H, W = 2, 1, 16, 16
    stem_ch, feat_dim, n_classes = 256, 256, 8

    key = jax.random.PRNGKey(0)
    kx, kp = jax.random.split(key)
    x = jax.random.normal(kx, (B, C_in, H, W), jnp.float32)  # PyTorch NCHW input
    params = init_params(kp, in_channels=C_in, stem_ch=stem_ch,
                         feat_dim=feat_dim, n_classes=n_classes)

    logits = net_model_forward(x, params)
    logits = jax.block_until_ready(logits)
    assert logits.shape == (B, n_classes)
    assert bool(jnp.all(jnp.isfinite(logits)))
    print("KERNEL_OK")
</pallas_src>

<mosaic_0001>
module attributes {stable_mosaic.version = 11 : i64} {
  func.func @_fused_backbone_head_kernel(%arg0: i32, %arg1: i32, %arg2: memref<2x64x9xbf16, #tpu.memory_space<vmem>>, %arg3: memref<9x256xbf16, #tpu.memory_space<vmem>>, %arg4: memref<1x256xf32, #tpu.memory_space<vmem>>, %arg5: memref<256x256xbf16, #tpu.memory_space<vmem>>, %arg6: memref<1x256xf32, #tpu.memory_space<vmem>>, %arg7: memref<256x128xbf16, #tpu.memory_space<vmem>>, %arg8: memref<1x128xf32, #tpu.memory_space<vmem>>, %arg9: memref<1x2x128xf32, #tpu.memory_space<vmem>>, %arg10: memref<2x8x256xf32, #tpu.memory_space<vmem>>) attributes {dimension_semantics = [#tpu.dimension_semantics<parallel>, #tpu.dimension_semantics<arbitrary>], iteration_bounds = array<i64: 1, 1>, scalar_prefetch = 0 : i64, scratch_operands = 1 : i64, tpu.core_type = #tpu.core_type<tc>, window_params = [{transform_indices = @transform_0, window_bounds = array<i64: 2, 64, 9>}, {pipeline_mode = #tpu.pipeline_mode<synchronous>, transform_indices = @transform_1, window_bounds = array<i64: 9, 256>}, {pipeline_mode = #tpu.pipeline_mode<synchronous>, transform_indices = @transform_2, window_bounds = array<i64: 1, 256>}, {pipeline_mode = #tpu.pipeline_mode<synchronous>, transform_indices = @transform_3, window_bounds = array<i64: 256, 256>}, {pipeline_mode = #tpu.pipeline_mode<synchronous>, transform_indices = @transform_4, window_bounds = array<i64: 1, 256>}, {pipeline_mode = #tpu.pipeline_mode<synchronous>, transform_indices = @transform_5, window_bounds = array<i64: 256, 128>}, {pipeline_mode = #tpu.pipeline_mode<synchronous>, transform_indices = @transform_6, window_bounds = array<i64: 1, 128>}, {transform_indices = @transform_7, window_bounds = array<i64: 1, 2, 128>}]} {
    %c0_i32 = arith.constant 0 : i32
    %0 = arith.cmpi eq, %arg1, %c0_i32 : i32
    %1 = arith.extui %0 : i1 to i32
    %c0_i32_0 = arith.constant 0 : i32
    %2 = arith.cmpi ne, %1, %c0_i32_0 : i32
    scf.if %2 {
      %cst_27 = arith.constant 0.000000e+00 : f32
      %41 = vector.broadcast %cst_27 : f32 to vector<2x8x256xf32>
      %c0_28 = arith.constant 0 : index
      %c0_29 = arith.constant 0 : index
      %c0_30 = arith.constant 0 : index
      %42 = vector.load %arg10[%c0_28, %c0_29, %c0_30] : memref<2x8x256xf32, #tpu.memory_space<vmem>>, vector<2x8x256xf32>
      tpu.vector_store %arg10[%c0_28, %c0_29, %c0_30], %41 {strides = array<i32>} : memref<2x8x256xf32, #tpu.memory_space<vmem>>, vector<2x8x256xf32>,
    } else {
    }
    %c0 = arith.constant 0 : index
    %c0_1 = arith.constant 0 : index
    %c0_2 = arith.constant 0 : index
    %3 = vector.load %arg2[%c0, %c0_1, %c0_2] : memref<2x64x9xbf16, #tpu.memory_space<vmem>>, vector<2x64x9xbf16>
    %4 = vector.shape_cast %3 : vector<2x64x9xbf16> to vector<128x9xbf16>
    %c0_3 = arith.constant 0 : index
    %c0_4 = arith.constant 0 : index
    %5 = vector.load %arg3[%c0_3, %c0_4] : memref<9x256xbf16, #tpu.memory_space<vmem>>, vector<9x256xbf16>
    %cst = arith.constant dense<0.000000e+00> : vector<128x256xf32>
    %6 = tpu.matmul %4, %5, %cst {dimension_numbers = #tpu.dot_dimension_numbers<[1], [0], [0], [1], [0, 0, 1, 1], [], []>} : vector<128x9xbf16>, vector<9x256xbf16>, vector<128x256xf32> -> vector<128x256xf32>
    %c0_5 = arith.constant 0 : index
    %c0_6 = arith.constant 0 : index
    %7 = vector.load %arg4[%c0_5, %c0_6] : memref<1x256xf32, #tpu.memory_space<vmem>>, vector<1x256xf32>
    %8 = vector.broadcast %7 : vector<1x256xf32> to vector<128x256xf32>
    %9 = arith.addf %6, %8 : vector<128x256xf32>
    %cst_7 = arith.constant 5.000000e-01 : f32
    %10 = vector.broadcast %cst_7 : f32 to vector<128x256xf32>
    %11 = arith.mulf %10, %9 : vector<128x256xf32>
    %12 = math.tanh %11 : vector<128x256xf32>
    %cst_8 = arith.constant 5.000000e-01 : f32
    %13 = vector.broadcast %cst_8 : f32 to vector<128x256xf32>
    %14 = arith.mulf %13, %12 : vector<128x256xf32>
    %cst_9 = arith.constant 5.000000e-01 : f32
    %15 = vector.broadcast %cst_9 : f32 to vector<128x256xf32>
    %16 = arith.addf %15, %14 : vector<128x256xf32>
    %17 = arith.mulf %9, %16 : vector<128x256xf32>
    %18 = arith.truncf %17 : vector<128x256xf32> to vector<128x256xbf16>
    %c0_10 = arith.constant 0 : index
    %c0_11 = arith.constant 0 : index
    %19 = vector.load %arg5[%c0_10, %c0_11] : memref<256x256xbf16, #tpu.memory_space<vmem>>, vector<256x256xbf16>
    %cst_12 = arith.constant dense<0.000000e+00> : vector<128x256xf32>
    %20 = tpu.matmul %18, %19, %cst_12 {dimension_numbers = #tpu.dot_dimension_numbers<[1], [0], [0], [1], [0, 0, 1, 1], [], []>} : vector<128x256xbf16>, vector<256x256xbf16>, vector<128x256xf32> -> vector<128x256xf32>
    %c0_13 = arith.constant 0 : index
    %c0_14 = arith.constant 0 : index
    %21 = vector.load %arg6[%c0_13, %c0_14] : memref<1x256xf32, #tpu.memory_space<vmem>>, vector<1x256xf32>
    %22 = vector.broadcast %21 : vector<1x256xf32> to vector<128x256xf32>
    %23 = arith.addf %20, %22 : vector<128x256xf32>
    %cst_15 = arith.constant 5.000000e-01 : f32
    %24 = vector.broadcast %cst_15 : f32 to vector<128x256xf32>
    %25 = arith.mulf %24, %23 : vector<128x256xf32>
    %26 = math.tanh %25 : vector<128x256xf32>
    %cst_16 = arith.constant 5.000000e-01 : f32
    %27 = vector.broadcast %cst_16 : f32 to vector<128x256xf32>
    %28 = arith.mulf %27, %26 : vector<128x256xf32>
    %cst_17 = arith.constant 5.000000e-01 : f32
    %29 = vector.broadcast %cst_17 : f32 to vector<128x256xf32>
    %30 = arith.addf %29, %28 : vector<128x256xf32>
    %31 = arith.mulf %23, %30 : vector<128x256xf32>
    %32 = vector.shape_cast %31 : vector<128x256xf32> to vector<2x64x256xf32>
    %c0_18 = arith.constant 0 : index
    %c0_19 = arith.constant 0 : index
    %c0_20 = arith.constant 0 : index
    %33 = vector.load %arg10[%c0_18, %c0_19, %c0_20] : memref<2x8x256xf32, #tpu.memory_space<vmem>>, vector<2x8x256xf32>
    %34 = vector.shape_cast %32 : vector<2x64x256xf32> to vector<2x8x8x256xf32>
    %cst_21 = arith.constant dense<0.000000e+00> : vector<2x8x256xf32>
    %35 = vector.multi_reduction <add>, %34, %cst_21 [1] : vector<2x8x8x256xf32> to vector<2x8x256xf32>
    %36 = arith.addf %33, %35 : vector<2x8x256xf32>
    %c0_22 = arith.constant 0 : index
    %c0_23 = arith.constant 0 : index
    %c0_24 = arith.constant 0 : index
    %37 = vector.load %arg10[%c0_22, %c0_23, %c0_24] : memref<2x8x256xf32, #tpu.memory_space<vmem>>, vector<2x8x256xf32>
    tpu.vector_store %arg10[%c0_22, %c0_23, %c0_24], %36 {strides = array<i32>} : memref<2x8x256xf32, #tpu.memory_space<vmem>>, vector<2x8x256xf32>,
    %c0_i32_25 = arith.constant 0 : i32
    %38 = arith.cmpi eq, %arg1, %c0_i32_25 : i32
    %39 = arith.extui %38 : i1 to i32
    %c0_i32_26 = arith.constant 0 : i32
    %40 = arith.cmpi ne, %39, %c0_i32_26 : i32
    scf.if %40 {
      %c0_27 = arith.constant 0 : index
      %c0_28 = arith.constant 0 : index
      %c0_29 = arith.constant 0 : index
      %41 = vector.load %arg10[%c0_27, %c0_28, %c0_29] : memref<2x8x256xf32, #tpu.memory_space<vmem>>, vector<2x8x256xf32>
      %cst_30 = arith.constant dense<0.000000e+00> : vector<2x256xf32>
      %42 = vector.multi_reduction <add>, %41, %cst_30 [1] : vector<2x8x256xf32> to vector<2x256xf32>
      %cst_31 = arith.constant 1.562500e-02 : f32
      %43 = vector.broadcast %cst_31 : f32 to vector<2x256xf32>
      %44 = arith.mulf %42, %43 : vector<2x256xf32>
      %45 = arith.truncf %44 : vector<2x256xf32> to vector<2x256xbf16>
      %c0_32 = arith.constant 0 : index
      %c0_33 = arith.constant 0 : index
      %46 = vector.load %arg7[%c0_32, %c0_33] : memref<256x128xbf16, #tpu.memory_space<vmem>>, vector<256x128xbf16>
      %cst_34 = arith.constant dense<0.000000e+00> : vector<2x128xf32>
      %47 = tpu.matmul %45, %46, %cst_34 {dimension_numbers = #tpu.dot_dimension_numbers<[1], [0], [0], [1], [0, 0, 1, 1], [], []>} : vector<2x256xbf16>, vector<256x128xbf16>, vector<2x128xf32> -> vector<2x128xf32>
      %c0_35 = arith.constant 0 : index
      %c0_36 = arith.constant 0 : index
      %48 = vector.load %arg8[%c0_35, %c0_36] : memref<1x128xf32, #tpu.memory_space<vmem>>, vector<1x128xf32>
      %49 = vector.broadcast %48 : vector<1x128xf32> to vector<2x128xf32>
      %50 = arith.addf %47, %49 : vector<2x128xf32>
      %51 = vector.shape_cast %50 : vector<2x128xf32> to vector<1x2x128xf32>
      %c0_37 = arith.constant 0 : index
      %c0_38 = arith.constant 0 : index
      %c0_39 = arith.constant 0 : index
      %52 = vector.load %arg9[%c0_37, %c0_38, %c0_39] : memref<1x2x128xf32, #tpu.memory_space<vmem>>, vector<1x2x128xf32>
      tpu.vector_store %arg9[%c0_37, %c0_38, %c0_39], %51 {strides = array<i32>} : memref<1x2x128xf32, #tpu.memory_space<vmem>>, vector<1x2x128xf32>,
    } else {
    }
    return
  }
  func.func @transform_0(%arg0: i32, %arg1: i32) -> (i32, i32, i32) {
    %c0_i32 = arith.constant 0 : i32
    %c0_i32_0 = arith.constant 0 : i32
    return %arg0, %arg1, %c0_i32 : i32, i32, i32
  }
  func.func @transform_1(%arg0: i32, %arg1: i32) -> (i32, i32) {
    %c0_i32 = arith.constant 0 : i32
    %c0_i32_0 = arith.constant 0 : i32
    %c0_i32_1 = arith.constant 0 : i32
    return %c0_i32, %c0_i32_0 : i32, i32
  }
  func.func @transform_2(%arg0: i32, %arg1: i32) -> (i32, i32) {
    %c0_i32 = arith.constant 0 : i32
    %c0_i32_0 = arith.constant 0 : i32
    %c0_i32_1 = arith.constant 0 : i32
    return %c0_i32, %c0_i32_0 : i32, i32
  }
  func.func @transform_3(%arg0: i32, %arg1: i32) -> (i32, i32) {
    %c0_i32 = arith.constant 0 : i32
    %c0_i32_0 = arith.constant 0 : i32
    %c0_i32_1 = arith.constant 0 : i32
    return %c0_i32, %c0_i32_0 : i32, i32
  }
  func.func @transform_4(%arg0: i32, %arg1: i32) -> (i32, i32) {
    %c0_i32 = arith.constant 0 : i32
    %c0_i32_0 = arith.constant 0 : i32
    %c0_i32_1 = arith.constant 0 : i32
    return %c0_i32, %c0_i32_0 : i32, i32
  }
  func.func @transform_5(%arg0: i32, %arg1: i32) -> (i32, i32) {
    %c0_i32 = arith.constant 0 : i32
    %c0_i32_0 = arith.constant 0 : i32
    %c0_i32_1 = arith.constant 0 : i32
    return %c0_i32, %c0_i32_0 : i32, i32
  }
  func.func @transform_6(%arg0: i32, %arg1: i32) -> (i32, i32) {
    %c0_i32 = arith.constant 0 : i32
    %c0_i32_0 = arith.constant 0 : i32
    %c0_i32_1 = arith.constant 0 : i32
    return %c0_i32, %c0_i32_0 : i32, i32
  }
  func.func @transform_7(%arg0: i32, %arg1: i32) -> (i32, i32, i32) {
    %c0_i32 = arith.constant 0 : i32
    %c0_i32_0 = arith.constant 0 : i32
    %c0_i32_1 = arith.constant 0 : i32
    return %arg0, %c0_i32, %c0_i32_0 : i32, i32, i32
  }
}

</mosaic_0001>

<bundles_post_ra>
// kernel: tpu_custom_call.1
= control target key start
LH: loop header
LB: loop body
LE: loop exit
PB: predicated region body
PF: predicated region fallthrough
CT: control target
= control target key end

     0   :  { %12 = vsyncpa [#allocation4], 0  ;;  %s2041_s0 = inlined_call_operand.vmem [shape: bf16[2,64,9], index: 0, kind: input, shape index: {}]   ;;  %s2042_s1 = inlined_call_operand.vmem [shape: bf16[9,256], index: 1, kind: input, shape index: {}]   ;;  %s2043_s2 = inlined_call_operand.vmem [shape: f32[1,256], index: 2, kind: input, shape index: {}]   ;;  %s2044_s3 = inlined_call_operand.hbm [shape: bf16[256,256], index: 3, kind: input, shape index: {}]   ;;  %s2045_s4 = inlined_call_operand.vmem [shape: f32[1,256], index: 4, kind: input, shape index: {}]   ;;  %s2046_s5 = inlined_call_operand.hbm [shape: bf16[256,128], index: 5, kind: input, shape index: {}]   ;;  %s2047_s6 = inlined_call_operand.vmem [shape: f32[1,128], index: 6, kind: input, shape index: {}]   ;;  %s2048_s7 = inlined_call_operand.hbm [shape: f32[1,2,128], index: 7, kind: output, shape index: {}]  }
   0x1   :  { %13 = vsyncpa [#allocation7], 0 }
   0x2   :  { %14 = vsyncpa [#allocation5], 0  ;;  %s1596_s24 = smov [#allocation3]  }
   0x3   :  { %s26_s25 = sshll.u32 %s1596_s24, 4  ;;  %s27_s25 = int_to_ptr.vmem [resolvable:$true] %s26_s25 }
   0x4   :  { %s1538_s26 = scalar_lea.vmem %s27_s25, 4096  ;;  %p1543_p1 = scmp.lt.s32.totalorder %s27_s25, %s27_s25 }
   0x5   :  { %p1539_p0 = scmp.ne.s32.totalorder %s27_s25, %s1538_s26  ;;  %p1544_p2 = scmp.lt.s32.totalorder %s1538_s26, %s1538_s26 }
   0x7   :  { %p1545_p3 = por %p1544_p2, %p1543_p1 }
   0x9   :  { %p1546_p4 = pnand %p1545_p3, %p1539_p0 }
   0xb   :  { %1549 = shalt.err (!%p1546_p4)
}
   0xc   :  { %s1597_s27 = smov 128   ;;  %s1598_s28 = smov 8  }
   0xd   :  { %32 = dma.hbm_to_vmem [thread:$0]  %s2044_s3, 4096, %s27_s25, [#allocation4], %s1597_s27, %s1597_s27, %s1598_s28  }
   0xe   :  { %s1599_s8 = smov [#allocation6]  }
   0xf   :  { %s40_s9 = sshll.u32 %s1599_s8, 4  ;;  %s41_s9 = int_to_ptr.vmem [resolvable:$true] %s40_s9 }
  0x10   :  { %s1558_s10 = scalar_lea.vmem %s41_s9, 2048  ;;  %p1563_p6 = scmp.lt.s32.totalorder %s41_s9, %s41_s9 }
  0x11   :  { %p1559_p5 = scmp.ne.s32.totalorder %s41_s9, %s1558_s10  ;;  %p1564_p7 = scmp.lt.s32.totalorder %s1558_s10, %s1558_s10 }
  0x13   :  { %p1565_p8 = por %p1564_p7, %p1563_p6 }
  0x15   :  { %p1566_p9 = pnand %p1565_p8, %p1559_p5 }
  0x17   :  { %1569 = shalt.err (!%p1566_p9)
}
  0x18   :  { %s1600_s11 = smov 64   ;;  %s1601_s12 = smov 4  }
  0x19   :  { %46 = dma.hbm_to_vmem [thread:$0]  %s2046_s5, 2048, %s41_s9, [#allocation7], %s1600_s11, %s1600_s11, %s1601_s12  }
  0x1a   :  { %1590 = dma.done.wait [#allocation4], 4096  }
  0x1b   :  { %1591 = vsyncadd [#allocation4], 4294963200 }
  0x1c   :  { %1592 = dma.done.wait [#allocation7], 2048  }
  0x1d   :  { %1593 = vsyncadd [#allocation7], 4294965248  ;;  %vm167_vm0 = vcmask 1043456   ;;  %v1602_v0 = vmov 0   ;;  %vm168_vm1 = vcmask 1044480   ;;  %v1603_v1 = vmov 65535  }
  0x1e   :  { %209 = vmatprep.mubr.bf16.mxu0 %v1602_v0  ;;  %v169_v2 = vsel %vm167_vm0, 4294967295, %v1603_v1  ;;  %v1327_v4 = vld [vmem:[%s2042_s1 + $0x4] ss:$8 sps:$4 sm:$0x1f]   ;;  %vm142_vm2 = vcmask 72704   ;;  %v1332_v17 = vld [vmem:[%s2041_s0 + $0x10] sm:$0xff]   ;;  %v84_v48 = vlaneseq }
  0x1f   :  { %v170_v3 = vsel %vm168_vm1, %v169_v2, 0  ;;  %v1329_v5 = vld [vmem:[%s2042_s1] ss:$8 sps:$4 sm:$0x1f]   ;;  %v1338_v9 = vld [vmem:[#allocation3 + $0x74] ss:$8 sps:$4 sm:$0xff]  }
  0x20   :  { %v175_v6 = vand.u32 %v1327_v4, %v170_v3  ;;  %v172_v7 = vand.u32 %v1329_v5, %v170_v3  ;;  %v1330_v8 = vld [vmem:[%s2041_s0] sm:$0xff]   ;;  %v1340_v10 = vld [vmem:[#allocation3 + $0x70] ss:$8 sps:$4 sm:$0xff]   ;;  %v1331_v12 = vld [vmem:[%s2041_s0 + $0x8] sm:$0xff]   ;;  %670 = vmatprep.subr.bf16.mxu1 %v1338_v9  ;;  %v1697_v49 = vshrl.u32 %v84_v48, 7  ;;  %vm1069_vm3 = vcmask 1041409  }
  0x21   :  { %v1341_v11 = vld [vmem:[#allocation3 + $0x64] ss:$8 sps:$4 sm:$0xff]   ;;  %671 = vmatpush1.bf16.msra.mxu1 %v1340_v10  ;;  %v1343_v13 = vld [vmem:[#allocation3 + $0x60] ss:$8 sps:$4 sm:$0xff]   ;;  %v1344_v14 = vld [vmem:[#allocation3 + $0x54] ss:$8 sps:$4 sm:$0xff]  }
  0x22   :  { %191 = vmatprep.subr.bf16.mxu0 %v175_v6  ;;  %672 = vmatprep.subr.bf16.mxu1 %v1341_v11  ;;  %v1346_v15 = vld [vmem:[#allocation3 + $0x50] ss:$8 sps:$4 sm:$0xff]   ;;  %v1347_v16 = vld [vmem:[#allocation3 + $0x44] ss:$8 sps:$4 sm:$0xff]   ;;  %v1349_v18 = vld [vmem:[#allocation3 + $0x40] ss:$8 sps:$4 sm:$0xff]  }
  0x23   :  { %192 = vmatpush1.bf16.msra.mxu0 %v172_v7  ;;  %v1350_v19 = vld [vmem:[#allocation3 + $0x34] ss:$8 sps:$4 sm:$0xff]   ;;  %v1352_v20 = vld [vmem:[#allocation3 + $0x30] ss:$8 sps:$4 sm:$0xff]   ;;  %v1353_v21 = vld [vmem:[#allocation3 + $0x24] ss:$8 sps:$4 sm:$0xff]  }
  0x24   :  { %v1333_v22 = vld [vmem:[%s2041_s0 + $0x18] sm:$0xff]   ;;  %v1355_v23 = vld [vmem:[#allocation3 + $0x20] ss:$8 sps:$4 sm:$0xff]   ;;  %v1359_v26 = vld [vmem:[#allocation3 + $0x4] ss:$8 sps:$4 sm:$0xff]   ;;  %v86_v50 = vsub.s32 0, %v1697_v49 }
  0x25   :  { %673 = vmatpush1.bf16.msra.mxu1 %v1343_v13  ;;  %v1356_v24 = vld [vmem:[#allocation3 + $0x14] ss:$8 sps:$4 sm:$0xff]   ;;  %v1358_v25 = vld [vmem:[#allocation3 + $0x10] ss:$8 sps:$4 sm:$0xff]   ;;  %v1334_v27 = vld [vmem:[%s2041_s0 + $0x20] sm:$0xff]   ;;  %v90_v52 = vsub.s32 1, %v1697_v49 }
  0x26   :  { %1239 = vmatmul.mubr.msk.bf16.vlgmr.msra.gmra.mxu0 %vm142_vm2, %v1330_v8  ;;  %674 = vmatprep.subr.bf16.mxu1 %v1344_v14  ;;  %v1361_v28 = vld [vmem:[#allocation3] ss:$8 sps:$4 sm:$0xff]   ;;  %v1336_v30 = vld [vmem:[%s2041_s0 + $0x30] sm:$0xff]   ;;  %v1337_v31 = vld [vmem:[%s2041_s0 + $0x38] sm:$0xff]   ;;  %s1604_s12 = smov [#allocation8]  }
  0x27   :  { %219 = vmatprep.mubr.bf16.mxu0 %v1602_v0  ;;  %v1335_v29 = vld [vmem:[%s2041_s0 + $0x28] sm:$0xff]   ;;  %v1362_v32 = vld [vmem:[#allocation3 + $0xf4] ss:$8 sps:$4 sm:$0xff]   ;;  %v1364_v33 = vld [vmem:[#allocation3 + $0xf0] ss:$8 sps:$4 sm:$0xff]   ;;  %s1219_s13 = sshll.u32 %s1604_s12, 4  ;;  %s1220_s13 = int_to_ptr.vmem [resolvable:$true] %s1219_s13 }
  0x28   :  { %v1365_v34 = vld [vmem:[#allocation3 + $0xe4] ss:$8 sps:$4 sm:$0xff]   ;;  %v1367_v35 = vld [vmem:[#allocation3 + $0xe0] ss:$8 sps:$4 sm:$0xff]   ;;  %v1368_v36 = vld [vmem:[#allocation3 + $0xd4] ss:$8 sps:$4 sm:$0xff]   ;;  %p1575_p11 = scmp.lt.s32.totalorder %s1220_s13, %s1220_s13 }
  0x29   :  { %675 = vmatpush1.bf16.msra.mxu1 %v1346_v15  ;;  %v1370_v37 = vld [vmem:[#allocation3 + $0xd0] ss:$8 sps:$4 sm:$0xff]   ;;  %v1371_v38 = vld [vmem:[#allocation3 + $0xc4] ss:$8 sps:$4 sm:$0xff]   ;;  %v1373_v39 = vld [vmem:[#allocation3 + $0xc0] ss:$8 sps:$4 sm:$0xff]  }
  0x2a   :  { %676 = vmatprep.subr.bf16.mxu1 %v1347_v16  ;;  %v1374_v40 = vld [vmem:[#allocation3 + $0xb4] ss:$8 sps:$4 sm:$0xff]   ;;  %v1376_v41 = vld [vmem:[#allocation3 + $0xb0] ss:$8 sps:$4 sm:$0xff]   ;;  %v1377_v42 = vld [vmem:[#allocation3 + $0xa4] ss:$8 sps:$4 sm:$0xff]  }
  0x2b   :  { %v1379_v43 = vld [vmem:[#allocation3 + $0xa0] ss:$8 sps:$4 sm:$0xff]   ;;  %v1380_v44 = vld [vmem:[#allocation3 + $0x94] ss:$8 sps:$4 sm:$0xff]   ;;  %v1382_v45 = vld [vmem:[#allocation3 + $0x90] ss:$8 sps:$4 sm:$0xff]  }
  0x2c   :  { %v1383_v46 = vld [vmem:[#allocation3 + $0x84] ss:$8 sps:$4 sm:$0xff]   ;;  %v1385_v47 = vld [vmem:[#allocation3 + $0x80] ss:$8 sps:$4 sm:$0xff]   ;;  %s1570_s14 = scalar_lea.vmem %s1220_s13, 32 }
  0x2d   :  { %677 = vmatpush1.bf16.msra.mxu1 %v1349_v18  ;;  %v82_v51 = vld [vmem:[%s2043_s2] sm:$0x3]  ;;  %p1571_p10 = scmp.ne.s32.totalorder %s1220_s13, %s1570_s14  ;;  %p1576_p12 = scmp.lt.s32.totalorder %s1570_s14, %s1570_s14 }
  0x2e   :  { %1240 = vmatmul.mubr.msk.bf16.gmra.mxu0 %vm142_vm2, %v1331_v12  ;;  %678 = vmatprep.subr.bf16.mxu1 %v1350_v19  ;;  %v1706_v53 = vrot.slane %v82_v51, %v86_v50  ;;  %v1710_v54 = vrot.slane %v82_v51, %v90_v52 }
  0x2f   :  { %229 = vmatprep.mubr.bf16.mxu0 %v1602_v0  ;;  %p1577_p13 = por %p1576_p12, %p1575_p11 }
  0x31   :  { %679 = vmatpush1.bf16.msra.mxu1 %v1352_v20  ;;  %p1578_p0 = pnand %p1577_p13, %p1571_p10 }
  0x32   :  { %680 = vmatprep.subr.bf16.mxu1 %v1353_v21 }
  0x35   :  { %681 = vmatpush1.bf16.msra.mxu1 %v1355_v23 }
  0x36   :  { %1241 = vmatmul.mubr.msk.bf16.gmra.mxu0 %vm142_vm2, %v1332_v17  ;;  %682 = vmatprep.subr.bf16.mxu1 %v1356_v24 }
  0x37   :  { %239 = vmatprep.mubr.bf16.mxu0 %v1602_v0 }
  0x39   :  { %683 = vmatpush1.bf16.msra.mxu1 %v1358_v25 }
  0x3a   :  { %684 = vmatprep.subr.bf16.mxu1 %v1359_v26 }
  0x3d   :  { %685 = vmatpush1.bf16.msra.mxu1 %v1361_v28 }
  0x3e   :  { %1242 = vmatmul.mubr.msk.bf16.gmra.mxu0 %vm142_vm2, %v1333_v22  ;;  %686 = vmatprep.subr.bf16.mxu1 %v1362_v32 }
  0x3f   :  { %249 = vmatprep.mubr.bf16.mxu0 %v1602_v0 }
  0x41   :  { %687 = vmatpush2.bf16.msra.mxu1 %v1364_v33 }
  0x42   :  { %688 = vmatprep.subr.bf16.mxu1 %v1365_v34 }
  0x45   :  { %689 = vmatpush2.bf16.msra.mxu1 %v1367_v35 }
  0x46   :  { %1243 = vmatmul.mubr.msk.bf16.gmra.mxu0 %vm142_vm2, %v1334_v27  ;;  %690 = vmatprep.subr.bf16.mxu1 %v1368_v36 }
  0x47   :  { %259 = vmatprep.mubr.bf16.mxu0 %v1602_v0 }
  0x49   :  { %691 = vmatpush2.bf16.msra.mxu1 %v1370_v37 }
  0x4a   :  { %692 = vmatprep.subr.bf16.mxu1 %v1371_v38 }
  0x4d   :  { %693 = vmatpush2.bf16.msra.mxu1 %v1373_v39 }
  0x4e   :  { %1244 = vmatmul.mubr.msk.bf16.gmra.mxu0 %vm142_vm2, %v1335_v29  ;;  %694 = vmatprep.subr.bf16.mxu1 %v1374_v40 }
  0x4f   :  { %269 = vmatprep.mubr.bf16.mxu0 %v1602_v0 }
  0x51   :  { %695 = vmatpush2.bf16.msra.mxu1 %v1376_v41 }
  0x52   :  { %696 = vmatprep.subr.bf16.mxu1 %v1377_v42 }
  0x55   :  { %697 = vmatpush2.bf16.msra.mxu1 %v1379_v43 }
  0x56   :  { %1245 = vmatmul.mubr.msk.bf16.gmra.mxu0 %vm142_vm2, %v1336_v30  ;;  %698 = vmatprep.subr.bf16.mxu1 %v1380_v44 }
  0x57   :  { %279 = vmatprep.mubr.bf16.mxu0 %v1602_v0 }
  0x59   :  { %699 = vmatpush2.bf16.msra.mxu1 %v1382_v45 }
  0x5a   :  { %700 = vmatprep.subr.bf16.mxu1 %v1383_v46 }
  0x5d   :  { %701 = vmatpush2.bf16.msra.mxu1 %v1385_v47 }
  0x5e   :  { %1246 = vmatmul.mubr.msk.bf16.gmra.mxu0 %vm142_vm2, %v1337_v31 }
  0xe6   :  { %v211_v55 = vpop.f32.mrf.mxu0 }
  0xe7   :  { %v1713_v56 = vadd.f32 %v211_v55, %v1706_v53 }
  0xe8   :  { %v213_v57 = vpop.f32.mrf.mxu0 }
  0xe9   :  { %v290_v58 = vmul.f32 0.5, %v1713_v56  ;;  %v1717_v59 = vadd.f32 %v213_v57, %v1710_v54 }
  0xea   :  { %v215_v60 = vpop.f32.mrf.mxu0 }
  0xeb   :  { %v291_v61 = vmul.f32 0.5, %v1717_v59  ;;  %v216_v62 = vadd.f32 %v215_v60, %v1706_v53  ;;  %1402 = vtanh.f32 %v290_v58 }
  0xec   :  { %v217_v63 = vpop.f32.mrf.mxu0 }
  0xed   :  { %1404 = vtanh.f32 %v291_v61  ;;  %v292_v0 = vmul.f32 0.5, %v216_v62  ;;  %v1722_v1 = vadd.f32 %v217_v63, %v1710_v54 }
  0xee   :  { %v221_v2 = vpop.f32.mrf.mxu0 }
  0xef   :  { %1406 = vtanh.f32 %v292_v0  ;;  %v293_v3 = vmul.f32 0.5, %v1722_v1  ;;  %v1726_v4 = vadd.f32 %v221_v2, %v1706_v53 }
  0xf0   :  { %v223_v5 = vpop.f32.mrf.mxu0 }
  0xf1   :  { %1408 = vtanh.f32 %v293_v3  ;;  %v294_v6 = vmul.f32 0.5, %v1726_v4  ;;  %v1730_v7 = vadd.f32 %v223_v5, %v1710_v54 }
  0xf2   :  { %v225_v8 = vpop.f32.mrf.mxu0 }
  0xf3   :  { %v295_v9 = vmul.f32 0.5, %v1730_v7  ;;  %v1734_v10 = vadd.f32 %v225_v8, %v1706_v53  ;;  %1410 = vtanh.f32 %v294_v6 }
  0xf4   :  { %v227_v11 = vpop.f32.mrf.mxu0 }
  0xf5   :  { %1412 = vtanh.f32 %v295_v9  ;;  %v296_v12 = vmul.f32 0.5, %v1734_v10  ;;  %v1738_v13 = vadd.f32 %v227_v11, %v1710_v54 }
  0xf6   :  { %v231_v14 = vpop.f32.mrf.mxu0 }
  0xf7   :  { %1414 = vtanh.f32 %v296_v12  ;;  %v297_v15 = vmul.f32 0.5, %v1738_v13  ;;  %v1742_v16 = vadd.f32 %v231_v14, %v1706_v53 }
  0xf8   :  { %v233_v17 = vpop.f32.mrf.mxu0  ;;  %v1403_v18 = vpop.eup %1402 }
  0xf9   :  { %1416 = vtanh.f32 %v297_v15  ;;  %v298_v19 = vmul.f32 0.5, %v1742_v16  ;;  %v1746_v20 = vadd.f32 %v233_v17, %v1710_v54  ;;  %v354_v28 = vmul.f32 0.5, %v1403_v18 }
  0xfa   :  { %v1405_v21 = vpop.eup %1404  ;;  %v235_v22 = vpop.f32.mrf.mxu0 }
  0xfb   :  { %v299_v23 = vmul.f32 0.5, %v1746_v20  ;;  %v1750_v24 = vadd.f32 %v235_v22, %v1706_v53  ;;  %1418 = vtanh.f32 %v298_v19  ;;  %v355_v27 = vmul.f32 0.5, %v1405_v21 }
  0xfc   :  { %v1407_v25 = vpop.eup %1406  ;;  %v237_v26 = vpop.f32.mrf.mxu0  ;;  %v386_v41 = vadd.f32 0.5, %v354_v28 }
  0xfd   :  { %v356_v29 = vmul.f32 0.5, %v1407_v25  ;;  %1420 = vtanh.f32 %v299_v23  ;;  %v300_v30 = vmul.f32 0.5, %v1750_v24  ;;  %v1754_v32 = vadd.f32 %v237_v26, %v1710_v54 }
  0xfe   :  { %v1409_v31 = vpop.eup %1408  ;;  %v241_v33 = vpop.f32.mrf.mxu0  ;;  %v387_v34 = vadd.f32 0.5, %v355_v27  ;;  %v418_v0 = vmul.f32 %v386_v41, %v1713_v56 }
  0xff   :  { %v388_v35 = vadd.f32 0.5, %v356_v29  ;;  %1422 = vtanh.f32 %v300_v30  ;;  %v1757_v36 = vadd.f32 %v241_v33, %v1706_v53  ;;  %v357_v37 = vmul.f32 0.5, %v1409_v31 }
 0x100   :  { %v301_v38 = vmul.f32 0.5, %v1754_v32  ;;  %v243_v39 = vpop.f32.mrf.mxu0  ;;  %v1411_v40 = vpop.eup %1410  ;;  %v419_v51 = vmul.f32 %v387_v34, %v1717_v59 }
 0x101   :  { %v302_v42 = vmul.f32 0.5, %v1757_v36  ;;  %v1762_v43 = vadd.f32 %v243_v39, %v1710_v54  ;;  %v389_v46 = vadd.f32 0.5, %v357_v37  ;;  %v420_v47 = vmul.f32 %v388_v35, %v216_v62 }
 0x102   :  { %v1413_v44 = vpop.eup %1412  ;;  %1424 = vtanh.f32 %v301_v38  ;;  %v245_v45 = vpop.f32.mrf.mxu0  ;;  %v358_v57 = vmul.f32 0.5, %v1411_v40 }
 0x103   :  { %1426 = vtanh.f32 %v302_v42  ;;  %v303_v48 = vmul.f32 0.5, %v1762_v43  ;;  %v359_v58 = vmul.f32 0.5, %v1413_v44  ;;  %v1767_v60 = vadd.f32 %v245_v45, %v1706_v53 }
 0x104   :  { %v1415_v55 = vpop.eup %1414  ;;  %v247_v61 = vpop.f32.mrf.mxu0  ;;  %v421_v63 = vmul.f32 %v389_v46, %v1722_v1  ;;  %v450_v12 = vpack.c.bf16 %v420_v47, %v418_v0  ;;  %v390_v14 = vadd.f32 0.5, %v358_v57 }
 0x105   :  { %v360_v2 = vmul.f32 0.5, %v1415_v55  ;;  %1428 = vtanh.f32 %v303_v48  ;;  %v304_v62 = vmul.f32 0.5, %v1767_v60  ;;  %v1773_v5 = vadd.f32 %v247_v61, %v1710_v54 }
 0x106   :  { %v1417_v3 = vpop.eup %1416  ;;  %v251_v59 = vpop.f32.mrf.mxu0  ;;  %v451_v6 = vpack.c.bf16 %v421_v63, %v419_v51  ;;  %v391_v1 = vadd.f32 0.5, %v359_v58  ;;  %v422_v29 = vmul.f32 %v390_v14, %v1726_v4 }
 0x107   :  { %v392_v8 = vadd.f32 0.5, %v360_v2  ;;  %v361_v9 = vmul.f32 0.5, %v1417_v3  ;;  %v1776_v11 = vadd.f32 %v251_v59, %v1706_v53  ;;  %1430 = vtanh.f32 %v304_v62 }
 0x108   :  { %v305_v56 = vmul.f32 0.5, %v1773_v5  ;;  %702 = vmatprep.mubr.bf16.mxu1 %v451_v6  ;;  %v253_v15 = vpop.f32.mrf.mxu0  ;;  %v1419_v17 = vpop.eup %1418  ;;  %v423_v30 = vmul.f32 %v391_v1, %v1730_v7 }
 0x109   :  { %v393_v18 = vadd.f32 0.5, %v361_v9  ;;  %v306_v19 = vmul.f32 0.5, %v1776_v11  ;;  %703 = vmatmul.mubr.bf16.vlgmr.msra.gmra.mxu1 %v450_v12  ;;  %v424_v22 = vmul.f32 %v392_v8, %v1734_v10  ;;  %v1782_v23 = vadd.f32 %v253_v15, %v1710_v54 }
 0x10a   :  { %v1421_v21 = vpop.eup %1420  ;;  %1432 = vtanh.f32 %v305_v56  ;;  %v255_v25 = vpop.f32.mrf.mxu0  ;;  %v362_v34 = vmul.f32 0.5, %v1419_v17 }
 0x10b   :  { %v425_v26 = vmul.f32 %v393_v18, %v1738_v13  ;;  %v363_v27 = vmul.f32 0.5, %v1421_v21  ;;  %1434 = vtanh.f32 %v306_v19  ;;  %v307_v31 = vmul.f32 0.5, %v1782_v23 }
 0x10c   :  { %v1423_v28 = vpop.eup %1422  ;;  %v1789_v33 = vadd.f32 %v255_v25, %v1706_v53  ;;  %v257_v10 = vpop.f32.mrf.mxu0  ;;  %v452_v40 = vpack.c.bf16 %v424_v22, %v422_v29  ;;  %v394_v48 = vadd.f32 0.5, %v362_v34 }
 0x10d   :  { %v364_v35 = vmul.f32 0.5, %v1423_v28  ;;  %v1792_v37 = vadd.f32 %v257_v10, %v1710_v54  ;;  %1436 = vtanh.f32 %v307_v31  ;;  %v453_v39 = vpack.c.bf16 %v425_v26, %v423_v30 }
 0x10e   :  { %v308_v13 = vmul.f32 0.5, %v1789_v33  ;;  %v261_v38 = vpop.f32.mrf.mxu0  ;;  %v395_v41 = vadd.f32 0.5, %v363_v27  ;;  %v426_v12 = vmul.f32 %v394_v48, %v1742_v16 }
 0x10f   :  { %v1425_v4 = vpop.eup %1424  ;;  %v396_v7 = vadd.f32 0.5, %v364_v35  ;;  %v309_v42 = vmul.f32 0.5, %v1792_v37  ;;  %v1797_v44 = vadd.f32 %v261_v38, %v1706_v53  ;;  %712 = vmatprep.mubr.bf16.mxu1 %v453_v39 }
 0x110   :  { %v1427_v45 = vpop.eup %1426  ;;  %v365_v46 = vmul.f32 0.5, %v1425_v4  ;;  %1438 = vtanh.f32 %v308_v13  ;;  %v263_v47 = vpop.f32.mrf.mxu0  ;;  %v427_v0 = vmul.f32 %v395_v41, %v1746_v20 }
 0x111   :  { %1440 = vtanh.f32 %v309_v42  ;;  %v310_v51 = vmul.f32 0.5, %v1797_v44  ;;  %713 = vmatmul.mubr.bf16.gmra.mxu1 %v452_v40  ;;  %v366_v58 = vmul.f32 0.5, %v1427_v45  ;;  %v1801_v61 = vadd.f32 %v263_v47, %v1710_v54 }
 0x112   :  { %v1429_v55 = vpop.eup %1428  ;;  %v397_v57 = vadd.f32 0.5, %v365_v46  ;;  %v265_v63 = vpop.f32.mrf.mxu0  ;;  %v428_v2 = vmul.f32 %v396_v7, %v1750_v24 }
 0x113   :  { %v1806_v3 = vadd.f32 %v265_v63, %v1706_v53  ;;  %v367_v59 = vmul.f32 0.5, %v1429_v55  ;;  %1442 = vtanh.f32 %v310_v51  ;;  %v311_v6 = vmul.f32 0.5, %v1801_v61 }
 0x114   :  { %v429_v62 = vmul.f32 %v397_v57, %v1754_v32  ;;  %v267_v8 = vpop.f32.mrf.mxu0  ;;  %v1431_v9 = vpop.eup %1430  ;;  %v398_v20 = vadd.f32 0.5, %v366_v58  ;;  %v454_v19 = vpack.c.bf16 %v428_v2, %v426_v12 }
 0x115   :  { %v312_v14 = vmul.f32 0.5, %v1806_v3  ;;  %v1813_v1 = vadd.f32 %v267_v8, %v1710_v54  ;;  %v368_v24 = vmul.f32 0.5, %v1431_v9  ;;  %1444 = vtanh.f32 %v311_v6 }
 0x116   :  { %v271_v56 = vpop.f32.mrf.mxu0  ;;  %v455_v15 = vpack.c.bf16 %v429_v62, %v427_v0  ;;  %v399_v16 = vadd.f32 0.5, %v367_v59  ;;  %v430_v35 = vmul.f32 %v398_v20, %v1757_v36 }
 0x117   :  { %v1433_v17 = vpop.eup %1432  ;;  %1446 = vtanh.f32 %v312_v14  ;;  %v313_v32 = vmul.f32 0.5, %v1813_v1  ;;  %v1817_v18 = vadd.f32 %v271_v56, %v1706_v53  ;;  %v400_v22 = vadd.f32 0.5, %v368_v24 }
 0x118   :  { %v1435_v21 = vpop.eup %1434  ;;  %v369_v25 = vmul.f32 0.5, %v1433_v17  ;;  %722 = vmatprep.mubr.bf16.mxu1 %v455_v15  ;;  %v273_v26 = vpop.f32.mrf.mxu0  ;;  %v431_v39 = vmul.f32 %v399_v16, %v1762_v43 }
 0x119   :  { %1448 = vtanh.f32 %v313_v32  ;;  %v314_v27 = vmul.f32 0.5, %v1817_v18  ;;  %v1821_v28 = vadd.f32 %v273_v26, %v1710_v54  ;;  %723 = vmatmul.mubr.bf16.gmra.mxu1 %v454_v19  ;;  %v432_v29 = vmul.f32 %v400_v22, %v1767_v60 }
 0x11a   :  { %v401_v30 = vadd.f32 0.5, %v369_v25  ;;  %v370_v31 = vmul.f32 0.5, %v1435_v21  ;;  %v275_v10 = vpop.f32.mrf.mxu0  ;;  %v1437_v34 = vpop.eup %1436 }
 0x11b   :  { %v315_v13 = vmul.f32 0.5, %v1821_v28  ;;  %v1827_v38 = vadd.f32 %v275_v10, %v1706_v53  ;;  %v371_v4 = vmul.f32 0.5, %v1437_v34  ;;  %1450 = vtanh.f32 %v314_v27 }
 0x11c   :  { %v433_v40 = vmul.f32 %v401_v30, %v1773_v5  ;;  %v277_v41 = vpop.f32.mrf.mxu0  ;;  %v402_v45 = vadd.f32 0.5, %v370_v31  ;;  %v456_v51 = vpack.c.bf16 %v432_v29, %v430_v35 }
 0x11d   :  { %v1439_v7 = vpop.eup %1438  ;;  %1452 = vtanh.f32 %v315_v13  ;;  %v316_v60 = vmul.f32 0.5, %v1827_v38  ;;  %v1833_v42 = vadd.f32 %v277_v41, %v1710_v54  ;;  %v403_v57 = vadd.f32 0.5, %v371_v4 }
 0x11e   :  { %v1441_v36 = vpop.eup %1440  ;;  %v372_v46 = vmul.f32 0.5, %v1439_v7  ;;  %v281_v47 = vpop.f32.mrf.mxu0  ;;  %v457_v48 = vpack.c.bf16 %v433_v40, %v431_v39  ;;  %v434_v12 = vmul.f32 %v402_v45, %v1776_v11 }
 0x11f   :  { %v373_v55 = vmul.f32 0.5, %v1441_v36  ;;  %1454 = vtanh.f32 %v316_v60  ;;  %v317_v43 = vmul.f32 0.5, %v1833_v42  ;;  %v1837_v5 = vadd.f32 %v281_v47, %v1706_v53 }
 0x120   :  { %v404_v58 = vadd.f32 0.5, %v372_v46  ;;  %732 = vmatprep.mubr.bf16.mxu1 %v457_v48  ;;  %v283_v63 = vpop.f32.mrf.mxu0  ;;  %v1443_v0 = vpop.eup %1442  ;;  %v435_v56 = vmul.f32 %v403_v57, %v1782_v23 }
 0x121   :  { %v405_v2 = vadd.f32 0.5, %v373_v55  ;;  %1456 = vtanh.f32 %v317_v43  ;;  %v318_v62 = vmul.f32 0.5, %v1837_v5  ;;  %733 = vmatmul.mubr.bf16.gmra.mxu1 %v456_v51  ;;  %v1842_v6 = vadd.f32 %v283_v63, %v1710_v54 }
 0x122   :  { %v436_v59 = vmul.f32 %v404_v58, %v1789_v33  ;;  %v285_v8 = vpop.f32.mrf.mxu0  ;;  %v1445_v9 = vpop.eup %1444  ;;  %v374_v15 = vmul.f32 0.5, %v1443_v0 }
 0x123   :  { %v437_v14 = vmul.f32 %v405_v2, %v1792_v37  ;;  %v1847_v20 = vadd.f32 %v285_v8, %v1706_v53  ;;  %v375_v17 = vmul.f32 0.5, %v1445_v9  ;;  %v319_v32 = vmul.f32 0.5, %v1842_v6 }
 0x124   :  { %v1447_v24 = vpop.eup %1446  ;;  %v287_v33 = vpop.f32.mrf.mxu0  ;;  %1458 = vtanh.f32 %v318_v62  ;;  %v458_v53 = vpack.c.bf16 %v436_v59, %v434_v12  ;;  %v406_v29 = vadd.f32 0.5, %v374_v15  ;;  %v1386_v15 = vld [vmem:[#allocation6 + $0x78] sm:$0xff]  }
 0x125   :  { %v376_v19 = vmul.f32 0.5, %v1447_v24  ;;  %v320_v21 = vmul.f32 0.5, %v1847_v20  ;;  %v288_v16 = vadd.f32 %v287_v33, %v1710_v54  ;;  %v407_v22 = vadd.f32 0.5, %v375_v17  ;;  %v1387_v17 = vld [vmem:[#allocation6 + $0x38] sm:$0xff]   ;;  %1296 = vmatprep.subr.bf16.mxu0 %v1386_v15  ;;  %v1389_v33 = vld [vmem:[#allocation6 + $0x30] sm:$0xff]  }
 0x126   :  { %v1449_v11 = vpop.eup %1448  ;;  %1460 = vtanh.f32 %v319_v32  ;;  %v459_v37 = vpack.c.bf16 %v437_v14, %v435_v56  ;;  %v438_v39 = vmul.f32 %v406_v29, %v1797_v44  ;;  %1297 = vmatpush3.bf16.msra.mxu0 %v1387_v17  ;;  %v1388_v32 = vld [vmem:[#allocation6 + $0x70] sm:$0xff]  }
 0x127   :  { %v408_v25 = vadd.f32 0.5, %v376_v19  ;;  %v377_v26 = vmul.f32 0.5, %v1449_v11  ;;  %1462 = vtanh.f32 %v320_v21  ;;  %v321_v23 = vmul.f32 0.5, %v288_v16  ;;  %1298 = vmatprep.subr.bf16.mxu0 %v1388_v32  ;;  %v1390_v19 = vld [vmem:[#allocation6 + $0x68] sm:$0xff]   ;;  %v1396_v11 = vld [vmem:[#allocation6 + $0x50] sm:$0xff]  }
 0x128   :  { %742 = vmatprep.mubr.bf16.mxu1 %v459_v37  ;;  %v1451_v27 = vpop.eup %1450  ;;  %v439_v10 = vmul.f32 %v407_v22, %v1801_v61  ;;  %v1391_v21 = vld [vmem:[#allocation6 + $0x28] sm:$0xff]   ;;  %v1397_v22 = vld [vmem:[#allocation6 + $0x10] sm:$0xff]  }
 0x129   :  { %v409_v30 = vadd.f32 0.5, %v377_v26  ;;  %1464 = vtanh.f32 %v321_v23  ;;  %743 = vmatmul.mubr.bf16.gmra.mxu1 %v458_v53  ;;  %v440_v54 = vmul.f32 %v408_v25, %v1806_v3  ;;  %v378_v40 = vmul.f32 0.5, %v1451_v27  ;;  %v1398_v37 = vld [vmem:[#allocation6 + $0x48] sm:$0xff]   ;;  %v1400_v25 = vld [vmem:[#allocation6 + $0x40] sm:$0xff]  }
 0x12a   :  { %v1453_v31 = vpop.eup %1452  ;;  %1299 = vmatpush3.bf16.msra.mxu0 %v1389_v33  ;;  %v1399_v53 = vld [vmem:[#allocation6 + $0x8] sm:$0xff]   ;;  %v1401_v26 = vld [vmem:[#allocation6] sm:$0xff]  }
 0x12b   :  { %v441_v34 = vmul.f32 %v409_v30, %v1813_v1  ;;  %v379_v35 = vmul.f32 0.5, %v1453_v31  ;;  %v460_v46 = vpack.c.bf16 %v440_v54, %v438_v39  ;;  %v410_v47 = vadd.f32 0.5, %v378_v40  ;;  %1300 = vmatprep.subr.bf16.mxu0 %v1390_v19  ;;  %v498_v30 = vld [vmem:[%s2045_s4] sm:$0x3] }
 0x12c   :  { %v1455_v13 = vpop.eup %1454 }
 0x12d   :  { %v380_v4 = vmul.f32 0.5, %v1455_v13  ;;  %v461_v41 = vpack.c.bf16 %v441_v34, %v439_v10  ;;  %v411_v60 = vadd.f32 0.5, %v379_v35  ;;  %v442_v57 = vmul.f32 %v410_v47, %v1817_v18 }
 0x12e   :  { %v1457_v7 = vpop.eup %1456  ;;  %1301 = vmatpush3.bf16.msra.mxu0 %v1391_v21  ;;  %v1869_v10 = vrot.slane %v498_v30, %v86_v50  ;;  %v1873_v34 = vrot.slane %v498_v30, %v90_v52 }
 0x12f   :  { %v412_v36 = vadd.f32 0.5, %v380_v4  ;;  %v381_v45 = vmul.f32 0.5, %v1457_v7  ;;  %752 = vmatprep.mubr.bf16.mxu1 %v461_v41  ;;  %v443_v1 = vmul.f32 %v411_v60, %v1821_v28 }
 0x131   :  { %v413_v48 = vadd.f32 0.5, %v381_v45  ;;  %753 = vmatmul.mubr.bf16.gmra.mxu1 %v460_v46  ;;  %v1459_v61 = vpop.eup %1458  ;;  %v444_v51 = vmul.f32 %v412_v36, %v1827_v38 }
 0x132   :  { %v382_v58 = vmul.f32 0.5, %v1459_v61 }
 0x133   :  { %v1461_v3 = vpop.eup %1460  ;;  %v445_v44 = vmul.f32 %v413_v48, %v1833_v42  ;;  %v462_v9 = vpack.c.bf16 %v444_v51, %v442_v57 }
 0x134   :  { %v1463_v55 = vpop.eup %1462  ;;  %v383_v43 = vmul.f32 0.5, %v1461_v3  ;;  %v414_v12 = vadd.f32 0.5, %v382_v58 }
 0x135   :  { %v384_v63 = vmul.f32 0.5, %v1463_v55  ;;  %v463_v0 = vpack.c.bf16 %v445_v44, %v443_v1 }
 0x136   :  { %v1465_v2 = vpop.eup %1464  ;;  %v415_v62 = vadd.f32 0.5, %v383_v43  ;;  %v446_v24 = vmul.f32 %v414_v12, %v1837_v5  ;;  %v1394_v5 = vld [vmem:[#allocation6 + $0x58] sm:$0xff]  }
 0x137   :  { %v416_v59 = vadd.f32 0.5, %v384_v63  ;;  %v385_v8 = vmul.f32 0.5, %v1465_v2  ;;  %762 = vmatprep.mubr.bf16.mxu1 %v463_v0 }
 0x138   :  { %v447_v28 = vmul.f32 %v415_v62, %v1842_v6  ;;  %v1392_v6 = vld [vmem:[#allocation6 + $0x60] sm:$0xff]  }
 0x139   :  { %v417_v14 = vadd.f32 0.5, %v385_v8  ;;  %763 = vmatmul.mubr.bf16.gmra.mxu1 %v462_v9  ;;  %v448_v38 = vmul.f32 %v416_v59, %v1847_v20  ;;  %v1393_v20 = vld [vmem:[#allocation6 + $0x20] sm:$0xff]   ;;  %1302 = vmatprep.subr.bf16.mxu0 %v1392_v6 }
 0x13a   :  { %1303 = vmatpush3.bf16.msra.mxu0 %v1393_v20 }
 0x13b   :  { %v449_v42 = vmul.f32 %v417_v14, %v288_v16  ;;  %v464_v56 = vpack.c.bf16 %v448_v38, %v446_v24  ;;  %v1395_v16 = vld [vmem:[#allocation6 + $0x18] sm:$0xff]   ;;  %1304 = vmatprep.subr.bf16.mxu0 %v1394_v5 }
 0x13d   :  { %v465_v18 = vpack.c.bf16 %v449_v42, %v447_v28 }
 0x13e   :  { %1305 = vmatpush3.bf16.msra.mxu0 %v1395_v16 }
 0x13f   :  { %772 = vmatprep.mubr.bf16.mxu1 %v465_v18  ;;  %1306 = vmatprep.subr.bf16.mxu0 %v1396_v11 }
 0x141   :  { %773 = vmatmul.mubr.bf16.gmra.mxu1 %v464_v56 }
 0x142   :  { %1307 = vmatpush3.bf16.msra.mxu0 %v1397_v22 }
 0x143   :  { %1308 = vmatprep.subr.bf16.mxu0 %v1398_v37 }
 0x146   :  { %1309 = vmatpush3.bf16.msra.mxu0 %v1399_v53 }
 0x147   :  { %1310 = vmatprep.subr.bf16.mxu0 %v1400_v25 }
 0x14a   :  { %1311 = vmatpush3.bf16.msra.mxu0 %v1401_v26 }
 0x1c9   :  { %v704_v23 = vpop.f32.mrf.mxu1 }
 0x1ca   :  { %v1879_v39 = vadd.f32 %v704_v23, %v1869_v10 }
 0x1cb   :  { %v706_v27 = vpop.f32.mrf.mxu1 }
 0x1cc   :  { %v1885_v41 = vadd.f32 %v706_v27, %v1873_v34  ;;  %v783_v49 = vmul.f32 0.5, %v1879_v39 }
 0x1cd   :  { %v708_v29 = vpop.f32.mrf.mxu1 }
 0x1ce   :  { %v1876_v13 = vadd.f32 %v708_v29, %v1869_v10  ;;  %v784_v36 = vmul.f32 0.5, %v1885_v41 }
 0x1cf   :  { %v710_v31 = vpop.f32.mrf.mxu1 }
 0x1d0   :  { %v1882_v4 = vadd.f32 %v710_v31, %v1873_v34  ;;  %v785_v7 = vmul.f32 0.5, %v1876_v13 }
 0x1d1   :  { %v714_v54 = vpop.f32.mrf.mxu1 }
 0x1d2   :  { %v786_v60 = vmul.f32 0.5, %v1882_v4  ;;  %1466 = vtanh.f32 %v785_v7  ;;  %v1892_v46 = vadd.f32 %v714_v54, %v1869_v10 }
 0x1d3   :  { %v716_v35 = vpop.f32.mrf.mxu1  ;;  %1468 = vtanh.f32 %v783_v49 }
 0x1d4   :  { %1470 = vtanh.f32 %v786_v60  ;;  %v1895_v48 = vadd.f32 %v716_v35, %v1873_v34  ;;  %v787_v1 = vmul.f32 0.5, %v1892_v46 }
 0x1d5   :  { %v718_v40 = vpop.f32.mrf.mxu1  ;;  %1472 = vtanh.f32 %v784_v36 }
 0x1d6   :  { %v1898_v61 = vadd.f32 %v718_v40, %v1869_v10  ;;  %v788_v55 = vmul.f32 0.5, %v1895_v48  ;;  %1474 = vtanh.f32 %v787_v1 }
 0x1d7   :  { %v720_v50 = vpop.f32.mrf.mxu1 }
 0x1d8   :  { %v1902_v51 = vadd.f32 %v720_v50, %v1873_v34  ;;  %v789_v43 = vmul.f32 0.5, %v1898_v61  ;;  %1476 = vtanh.f32 %v788_v55 }
 0x1d9   :  { %v724_v52 = vpop.f32.mrf.mxu1 }
 0x1da   :  { %v1907_v58 = vadd.f32 %v724_v52, %v1869_v10  ;;  %v790_v63 = vmul.f32 0.5, %v1902_v51  ;;  %1478 = vtanh.f32 %v789_v43 }
 0x1db   :  { %v726_v45 = vpop.f32.mrf.mxu1 }
 0x1dc   :  { %v1911_v0 = vadd.f32 %v726_v45, %v1873_v34  ;;  %v791_v9 = vmul.f32 0.5, %v1907_v58  ;;  %1480 = vtanh.f32 %v790_v63 }
 0x1dd   :  { %v728_v47 = vpop.f32.mrf.mxu1 }
 0x1de   :  { %v1914_v62 = vadd.f32 %v728_v47, %v1869_v10  ;;  %v792_v14 = vmul.f32 0.5, %v1911_v0  ;;  %1482 = vtanh.f32 %v791_v9 }
 0x1df   :  { %v730_v3 = vpop.f32.mrf.mxu1  ;;  %v1467_v12 = vpop.eup %1466 }
 0x1e0   :  { %v1917_v59 = vadd.f32 %v730_v3, %v1873_v34  ;;  %v1469_v42 = vpop.eup %1468  ;;  %v793_v24 = vmul.f32 0.5, %v1914_v62  ;;  %v849_v19 = vmul.f32 0.5, %v1467_v12  ;;  %1484 = vtanh.f32 %v792_v14 }
 0x1e1   :  { %v734_v44 = vpop.f32.mrf.mxu1  ;;  %v1471_v56 = vpop.eup %1470  ;;  %v847_v5 = vmul.f32 0.5, %v1469_v42 }
 0x1e2   :  { %v1922_v28 = vadd.f32 %v734_v44, %v1869_v10  ;;  %v794_v15 = vmul.f32 0.5, %v1917_v59  ;;  %v1473_v33 = vpop.eup %1472  ;;  %v850_v16 = vmul.f32 0.5, %v1471_v56  ;;  %1486 = vtanh.f32 %v793_v24 }
 0x1e3   :  { %v736_v57 = vpop.f32.mrf.mxu1  ;;  %v848_v22 = vmul.f32 0.5, %v1473_v33  ;;  %v881_v25 = vadd.f32 0.5, %v849_v19  ;;  %v1475_v30 = vpop.eup %1474  ;;  %v879_v31 = vadd.f32 0.5, %v847_v5 }
 0x1e4   :  { %v1926_v18 = vadd.f32 %v736_v57, %v1873_v34  ;;  %v795_v6 = vmul.f32 0.5, %v1922_v28  ;;  %1488 = vtanh.f32 %v794_v15  ;;  %v882_v54 = vadd.f32 0.5, %v850_v16 }
 0x1e5   :  { %v738_v2 = vpop.f32.mrf.mxu1  ;;  %v1477_v40 = vpop.eup %1476  ;;  %v880_v50 = vadd.f32 0.5, %v848_v22  ;;  %v913_v60 = vmul.f32 %v881_v25, %v1876_v13  ;;  %v851_v47 = vmul.f32 0.5, %v1475_v30  ;;  %v911_v43 = vmul.f32 %v879_v31, %v1879_v39 }
 0x1e6   :  { %v1930_v17 = vadd.f32 %v738_v2, %v1869_v10  ;;  %v796_v11 = vmul.f32 0.5, %v1926_v18  ;;  %1490 = vtanh.f32 %v795_v6  ;;  %v914_v57 = vmul.f32 %v882_v54, %v1882_v4 }
 0x1e7   :  { %v740_v8 = vpop.f32.mrf.mxu1  ;;  %v1479_v52 = vpop.eup %1478  ;;  %v912_v2 = vmul.f32 %v880_v50, %v1885_v41  ;;  %v883_v24 = vadd.f32 0.5, %v851_v47 }
 0x1e8   :  { %v1933_v21 = vadd.f32 %v740_v8, %v1873_v34  ;;  %v797_v37 = vmul.f32 0.5, %v1930_v17  ;;  %1492 = vtanh.f32 %v796_v11  ;;  %v852_v8 = vmul.f32 0.5, %v1477_v40 }
 0x1e9   :  { %v744_v38 = vpop.f32.mrf.mxu1  ;;  %v1481_v55 = vpop.eup %1480  ;;  %v853_v9 = vmul.f32 0.5, %v1479_v52  ;;  %v954_v33 = vadd.f32 %v914_v57, %v912_v2 }
 0x1ea   :  { %v798_v26 = vmul.f32 0.5, %v1933_v21  ;;  %v1940_v23 = vadd.f32 %v744_v38, %v1869_v10  ;;  %1494 = vtanh.f32 %v797_v37  ;;  %v947_v38 = vadd.f32 %v913_v60, %v911_v43 }
 0x1eb   :  { %v746_v32 = vpop.f32.mrf.mxu1  ;;  %v1483_v4 = vpop.eup %1482  ;;  %v854_v56 = vmul.f32 0.5, %v1481_v55  ;;  %v884_v5 = vadd.f32 0.5, %v852_v8  ;;  %v885_v16 = vadd.f32 0.5, %v853_v9 }
 0x1ec   :  { %v1943_v27 = vadd.f32 %v746_v32, %v1873_v34  ;;  %1496 = vtanh.f32 %v798_v26  ;;  %v799_v36 = vmul.f32 0.5, %v1940_v23 }
 0x1ed   :  { %v748_v20 = vpop.f32.mrf.mxu1  ;;  %v1485_v41 = vpop.eup %1484  ;;  %v886_v30 = vadd.f32 0.5, %v854_v56  ;;  %v917_v47 = vmul.f32 %v885_v16, %v1898_v61 }
 0x1ee   :  { %v1946_v35 = vadd.f32 %v748_v20, %v1869_v10  ;;  %v800_v3 = vmul.f32 0.5, %v1943_v27  ;;  %1498 = vtanh.f32 %v799_v36  ;;  %v856_v31 = vmul.f32 0.5, %v1485_v41 }
 0x1ef   :  { %v750_v53 = vpop.f32.mrf.mxu1  ;;  %v1487_v20 = vpop.eup %1486  ;;  %v916_v36 = vmul.f32 %v884_v5, %v1895_v48  ;;  %v918_v2 = vmul.f32 %v886_v30, %v1902_v51 }
 0x1f0   :  { %v1949_v7 = vadd.f32 %v750_v53, %v1873_v34  ;;  %v801_v13 = vmul.f32 0.5, %v1946_v35  ;;  %1500 = vtanh.f32 %v800_v3  ;;  %v855_v53 = vmul.f32 0.5, %v1483_v4 }
 0x1f1   :  { %v754_v29 = vpop.f32.mrf.mxu1  ;;  %v1489_v37 = vpop.eup %1488  ;;  %v857_v50 = vmul.f32 0.5, %v1487_v20  ;;  %v888_v8 = vadd.f32 0.5, %v856_v31 }
 0x1f2   :  { %v1954_v45 = vadd.f32 %v754_v29, %v1869_v10  ;;  %v802_v12 = vmul.f32 0.5, %v1949_v7  ;;  %1502 = vtanh.f32 %v801_v13  ;;  %v915_v29 = vmul.f32 %v883_v24, %v1892_v46 }
 0x1f3   :  { %v756_v49 = vpop.f32.mrf.mxu1  ;;  %v1491_v40 = vpop.eup %1490  ;;  %v858_v3 = vmul.f32 0.5, %v1489_v37  ;;  %v887_v55 = vadd.f32 0.5, %v855_v53  ;;  %v920_v20 = vmul.f32 %v888_v8, %v1911_v0 }
 0x1f4   :  { %v1958_v1 = vadd.f32 %v756_v49, %v1873_v34  ;;  %v803_v42 = vmul.f32 0.5, %v1954_v45  ;;  %1504 = vtanh.f32 %v802_v12  ;;  %v859_v9 = vmul.f32 0.5, %v1491_v40 }
 0x1f5   :  { %v758_v44 = vpop.f32.mrf.mxu1  ;;  %v1493_v60 = vpop.eup %1492  ;;  %v889_v12 = vadd.f32 0.5, %v857_v50  ;;  %v890_v4 = vadd.f32 0.5, %v858_v3  ;;  %v919_v41 = vmul.f32 %v887_v55, %v1907_v58 }
 0x1f6   :  { %v1964_v63 = vadd.f32 %v758_v44, %v1869_v10  ;;  %v804_v15 = vmul.f32 0.5, %v1958_v1  ;;  %1506 = vtanh.f32 %v803_v42  ;;  %v860_v61 = vmul.f32 0.5, %v1493_v60 }
 0x1f7   :  { %v760_v14 = vpop.f32.mrf.mxu1  ;;  %v1495_v44 = vpop.eup %1494  ;;  %v948_v42 = vadd.f32 %v947_v38, %v915_v29  ;;  %v891_v5 = vadd.f32 0.5, %v859_v9  ;;  %v922_v58 = vmul.f32 %v890_v4, %v1917_v59 }
 0x1f8   :  { %v1970_v39 = vadd.f32 %v760_v14, %v1873_v34  ;;  %v805_v19 = vmul.f32 0.5, %v1964_v63  ;;  %1508 = vtanh.f32 %v804_v15  ;;  %v861_v24 = vmul.f32 0.5, %v1495_v44 }
 0x1f9   :  { %v764_v32 = vpop.f32.mrf.mxu1  ;;  %v1497_v13 = vpop.eup %1496  ;;  %v949_v37 = vadd.f32 %v948_v42, %v917_v47 }
 0x1fa   :  { %v1975_v6 = vadd.f32 %v764_v32, %v1869_v10  ;;  %v806_v11 = vmul.f32 0.5, %v1970_v39  ;;  %1510 = vtanh.f32 %v805_v19  ;;  %v955_v32 = vadd.f32 %v954_v33, %v916_v36 }
 0x1fb   :  { %v766_v22 = vpop.f32.mrf.mxu1  ;;  %v862_v51 = vmul.f32 0.5, %v1497_v13  ;;  %v1499_v19 = vpop.eup %1498  ;;  %v892_v33 = vadd.f32 0.5, %v860_v61  ;;  %v893_v30 = vadd.f32 0.5, %v861_v24  ;;  %v923_v36 = vmul.f32 %v891_v5, %v1922_v28 }
 0x1fc   :  { %v807_v25 = vmul.f32 0.5, %v1975_v6  ;;  %v1980_v26 = vadd.f32 %v766_v22, %v1873_v34  ;;  %1512 = vtanh.f32 %v806_v11  ;;  %v956_v53 = vadd.f32 %v955_v32, %v918_v2 }
 0x1fd   :  { %v768_v54 = vpop.f32.mrf.mxu1  ;;  %v1501_v22 = vpop.eup %1500  ;;  %v894_v40 = vadd.f32 0.5, %v862_v51  ;;  %v863_v9 = vmul.f32 0.5, %v1499_v19 }
 0x1fe   :  { %v808_v49 = vmul.f32 0.5, %v1980_v26  ;;  %v1985_v52 = vadd.f32 %v768_v54, %v1869_v10  ;;  %1514 = vtanh.f32 %v807_v25  ;;  %v921_v25 = vmul.f32 %v889_v12, %v1914_v62 }
 0x1ff   :  { %v770_v46 = vpop.f32.mrf.mxu1  ;;  %v1503_v29 = vpop.eup %1502  ;;  %v950_v54 = vadd.f32 %v949_v37, %v919_v41  ;;  %v957_v60 = vadd.f32 %v956_v53, %v920_v20  ;;  %v924_v62 = vmul.f32 %v892_v33, %v1926_v18  ;;  %v926_v28 = vmul.f32 %v894_v40, %v1933_v21 }
 0x200   :  { %v809_v43 = vmul.f32 0.5, %v1985_v52  ;;  %v1991_v57 = vadd.f32 %v770_v46, %v1873_v34  ;;  %1516 = vtanh.f32 %v808_v49  ;;  %v865_v46 = vmul.f32 0.5, %v1503_v29 }
 0x201   :  { %v774_v48 = vpop.f32.mrf.mxu1  ;;  %v1505_v31 = vpop.eup %1504  ;;  %v951_v3 = vadd.f32 %v950_v54, %v921_v25  ;;  %v958_v55 = vadd.f32 %v957_v60, %v922_v58  ;;  %v895_v19 = vadd.f32 0.5, %v863_v9 }
 0x202   :  { %1518 = vtanh.f32 %v809_v43  ;;  %v810_v14 = vmul.f32 0.5, %v1991_v57  ;;  %v1996_v56 = vadd.f32 %v774_v48, %v1869_v10  ;;  %v925_v43 = vmul.f32 %v893_v30, %v1930_v17 }
 0x203   :  { %v776_v15 = vpop.f32.mrf.mxu1  ;;  %v1507_v49 = vpop.eup %1506  ;;  %v866_v13 = vmul.f32 0.5, %v1505_v31  ;;  %v952_v61 = vadd.f32 %v951_v3, %v923_v36  ;;  %v959_v24 = vadd.f32 %v958_v55, %v924_v62  ;;  %v897_v17 = vadd.f32 0.5, %v865_v46 }
 0x204   :  { %1520 = vtanh.f32 %v810_v14  ;;  %v811_v16 = vmul.f32 0.5, %v1996_v56  ;;  %v2002_v11 = vadd.f32 %v776_v15, %v1873_v34  ;;  %v867_v48 = vmul.f32 0.5, %v1507_v49 }
 0x205   :  { %v778_v38 = vpop.f32.mrf.mxu1  ;;  %v1509_v47 = vpop.eup %1508  ;;  %v864_v14 = vmul.f32 0.5, %v1501_v22  ;;  %v953_v32 = vadd.f32 %v952_v61, %v925_v43  ;;  %v898_v41 = vadd.f32 0.5, %v866_v13  ;;  %v960_v21 = vadd.f32 %v959_v24, %v926_v28 }
 0x206   :  { %1522 = vtanh.f32 %v811_v16  ;;  %v812_v0 = vmul.f32 0.5, %v2002_v11  ;;  %v2010_v59 = vadd.f32 %v778_v38, %v1869_v10  ;;  %v868_v10 = vmul.f32 0.5, %v1509_v47 }
 0x207   :  { %v780_v50 = vpop.f32.mrf.mxu1  ;;  %v1511_v44 = vpop.eup %1510  ;;  %v899_v20 = vadd.f32 0.5, %v867_v48  ;;  %v896_v38 = vadd.f32 0.5, %v864_v14  ;;  %v929_v53 = vmul.f32 %v897_v17, %v1946_v35  ;;  %v990_v29 = vrot.slane %v953_v32, 4 }
 0x208   :  { %1524 = vtanh.f32 %v812_v0  ;;  %v2014_v2 = vadd.f32 %v780_v50, %v1873_v34  ;;  %v813_v12 = vmul.f32 0.5, %v2010_v59  ;;  %v869_v15 = vmul.f32 0.5, %v1511_v44 }
 0x209   :  { %v1513_v8 = vpop.eup %1512  ;;  %v900_v22 = vadd.f32 0.5, %v868_v10  ;;  %v930_v58 = vmul.f32 %v898_v41, %v1949_v7  ;;  %v996_v54 = vrot.slane %v960_v21, 4  ;;  %v927_v40 = vmul.f32 %v895_v19, %v1940_v23 }
 0x20a   :  { %v814_v42 = vmul.f32 0.5, %v2014_v2  ;;  %1526 = vtanh.f32 %v813_v12  ;;  %v870_v51 = vmul.f32 0.5, %v1513_v8  ;;  %v901_v25 = vadd.f32 0.5, %v869_v15 }
 0x20b   :  { %v1515_v18 = vpop.eup %1514  ;;  %v931_v50 = vmul.f32 %v899_v20, %v1954_v45  ;;  %v928_v60 = vmul.f32 %v896_v38, %v1943_v27  ;;  %v932_v36 = vmul.f32 %v900_v22, %v1958_v1  ;;  %v961_v62 = vadd.f32 %v929_v53, %v927_v40 }
 0x20c   :  { %1528 = vtanh.f32 %v814_v42  ;;  %v871_v5 = vmul.f32 0.5, %v1515_v18  ;;  %v902_v30 = vadd.f32 0.5, %v870_v51  ;;  %v933_v46 = vmul.f32 %v901_v25, %v1964_v63 }
 0x20d   :  { %v1517_v4 = vpop.eup %1516  ;;  %v968_v44 = vadd.f32 %v930_v58, %v928_v60  ;;  %v991_v23 = vadd.f32 %v990_v29, %v953_v32  ;;  %v962_v8 = vadd.f32 %v961_v62, %v931_v50  ;;  %v997_v27 = vadd.f32 %v996_v54, %v960_v21 }
 0x20e   :  { %v872_v37 = vmul.f32 0.5, %v1517_v4  ;;  %v903_v49 = vadd.f32 0.5, %v871_v5  ;;  %v934_v55 = vmul.f32 %v902_v30, %v1970_v39 }
 0x20f   :  { %v1519_v34 = vpop.eup %1518  ;;  %v969_v9 = vadd.f32 %v968_v44, %v932_v36  ;;  %v963_v12 = vadd.f32 %v962_v8, %v933_v46  ;;  %v992_v10 = vrot.slane %v991_v23, 2 }
 0x210   :  { %v873_v33 = vmul.f32 0.5, %v1519_v34  ;;  %v904_v47 = vadd.f32 0.5, %v872_v37  ;;  %v935_v45 = vmul.f32 %v903_v49, %v1975_v6  ;;  %v998_v6 = vrot.slane %v997_v27, 2 }
 0x211   :  { %v1521_v16 = vpop.eup %1520  ;;  %v970_v61 = vadd.f32 %v969_v9, %v934_v55 }
 0x212   :  { %v874_v0 = vmul.f32 0.5, %v1521_v16  ;;  %v905_v7 = vadd.f32 0.5, %v873_v33  ;;  %v936_v1 = vmul.f32 %v904_v47, %v1980_v26  ;;  %v964_v42 = vadd.f32 %v963_v12, %v935_v45 }
 0x213   :  { %v1523_v31 = vpop.eup %1522 }
 0x214   :  { %v875_v35 = vmul.f32 0.5, %v1523_v31  ;;  %v906_v43 = vadd.f32 0.5, %v874_v0  ;;  %v937_v18 = vmul.f32 %v905_v7, %v1985_v52  ;;  %v971_v17 = vadd.f32 %v970_v61, %v936_v1 }
 0x215   :  { %v1525_v3 = vpop.eup %1524  ;;  %v993_v52 = vadd.f32 %v992_v10, %v991_v23 }
 0x216   :  { %v876_v13 = vmul.f32 0.5, %v1525_v3  ;;  %v907_v28 = vadd.f32 0.5, %v875_v35  ;;  %v938_v14 = vmul.f32 %v906_v43, %v1991_v57  ;;  %v965_v26 = vadd.f32 %v964_v42, %v937_v18 }
 0x217   :  { %v1527_v63 = vpop.eup %1526  ;;  %v999_v57 = vadd.f32 %v998_v6, %v997_v27  ;;  %v994_v38 = vrot.slane %v993_v52, 1 }
 0x218   :  { %v908_v48 = vadd.f32 0.5, %v876_v13  ;;  %v939_v4 = vmul.f32 %v907_v28, %v1996_v56  ;;  %v877_v24 = vmul.f32 0.5, %v1527_v63  ;;  %v972_v41 = vadd.f32 %v971_v17, %v938_v14  ;;  %v1279_v28 = vld [vmem:[%s2047_s6] ss:$0 sm:$0xff] }
 0x219   :  { %v1529_v39 = vpop.eup %1528  ;;  %v1000_v37 = vrot.slane %v999_v57, 1  ;;  %v995_v33 = vadd.f32 %v994_v38, %v993_v52 }
 0x21a   :  { %v940_v15 = vmul.f32 %v908_v48, %v2002_v11  ;;  %v878_v34 = vmul.f32 0.5, %v1529_v39  ;;  %v909_v32 = vadd.f32 0.5, %v877_v24  ;;  %v966_v21 = vadd.f32 %v965_v26, %v939_v4 }
 0x21b   :  { %v1001_v30 = vadd.f32 %v1000_v37, %v999_v57  ;;  %v1014_v54 = vmul.f32 0.015625, %v995_v33 }
 0x21c   :  { %v910_v51 = vadd.f32 0.5, %v878_v34  ;;  %v941_v19 = vmul.f32 %v909_v32, %v2010_v59  ;;  %v973_v20 = vadd.f32 %v972_v41, %v940_v15 }
 0x21d   :  { %v1015_v50 = vmul.f32 0.015625, %v1001_v30  ;;  %v1018_v60 = vpack.c.bf16 %v1014_v54, %v1014_v54 }
 0x21e   :  { %v942_v5 = vmul.f32 %v910_v51, %v2014_v2  ;;  %v967_v16 = vadd.f32 %v966_v21, %v941_v19 }
 0x21f   :  { %v1019_v35 = vpack.c.bf16 %v1015_v50, %v1015_v50  ;;  %v1065_v46 = vunpack.c.l.b16 %v1018_v60 }
 0x220   :  { %v974_v56 = vadd.f32 %v973_v20, %v942_v5  ;;  %v1002_v22 = vrot.slane %v967_v16, 4 }
 0x221   :  { %v1066_v44 = vunpack.c.l.b16 %v1019_v35 }
 0x222   :  { %v1008_v53 = vrot.slane %v974_v56, 4  ;;  %v1003_v11 = vadd.f32 %v1002_v22, %v967_v16 }
 0x224   :  { %v1009_v25 = vadd.f32 %v1008_v53, %v974_v56  ;;  %v1004_v29 = vrot.slane %v1003_v11, 2 }
 0x226   :  { %v1010_v58 = vrot.slane %v1009_v25, 2  ;;  %v1005_v0 = vadd.f32 %v1004_v29, %v1003_v11 }
 0x228   :  { %v1011_v31 = vadd.f32 %v1010_v58, %v1009_v25  ;;  %v1006_v59 = vrot.slane %v1005_v0, 1 }
 0x22a   :  { %v1012_v40 = vrot.slane %v1011_v31, 1  ;;  %v1007_v49 = vadd.f32 %v1006_v59, %v1005_v0 }
 0x22c   :  { %v1013_v2 = vadd.f32 %v1012_v40, %v1011_v31  ;;  %v1016_v36 = vmul.f32 0.015625, %v1007_v49 }
 0x22e   :  { %v1017_v47 = vmul.f32 0.015625, %v1013_v2  ;;  %v1020_v3 = vpack.c.bf16 %v1016_v36, %v1016_v36 }
 0x230   :  { %v1021_v62 = vpack.c.bf16 %v1017_v47, %v1017_v47  ;;  %v1067_v7 = vunpack.c.l.b16 %v1020_v3 }
 0x232   :  { %v1068_v55 = vunpack.c.l.b16 %v1021_v62  ;;  %v1070_v43 = vsel %vm1069_vm3, %v1067_v7, %v1065_v46 }
 0x233   :  { %v1072_v8 = vpack.c.b16 %v1070_v43, %v1070_v43 }
 0x234   :  { %v1071_v13 = vsel %vm1069_vm3, %v1068_v55, %v1066_v44 }
 0x235   :  { %v1073_v23 = vpack.c.b16 %v1071_v13, %v1071_v13 }
 0x237   :  { %1204 = vmatprep.mubr.bf16.mxu0 %v1073_v23 }
 0x238   :  { %1205 = vmatmul.mubr.bf16.vlgmr.msra.gmra.mxu0 %v1072_v8 }
 0x2f8   :  { %v1312_v45 = vpop.f32.mrf.mxu0 }
 0x2fa   :  { %v1313_v27 = vpop.f32.mrf.mxu0 }
 0x2fb   :  { %v1314_v9 = vadd.f32 %v1313_v27, %v1312_v45 }
 0x2fc   :  { %v1315_v1 = vpop.f32.mrf.mxu0 }
 0x2fd   :  { %v1207_v48 = vadd.f32 %v1314_v9, %v1279_v28 }
 0x2fe   :  { %v1316_v12 = vpop.f32.mrf.mxu0 }
 0x2ff   :  { %1212 = vst [vmem:[#allocation8] sm:$0x3] %v1207_v48 }
 0x300   :  { %1581 = shalt.err (!%p1578_p0)
}
 0x301   :  { %1222 = dma.vmem_to_hbm [thread:$0]  %s1220_s13, 32, %s2048_s7, [#allocation5]  }
 0x302   :  { %1594 = dma.done.wait [#allocation5], 32  }
 0x303   :  { %1595 = vsyncadd [#allocation5], 4294967264 }
 0x304   :  { %1226 = vsyncpa [#allocation4], 1 }
 0x305   :  { %1227 = vsyncpa [#allocation7], 1 }
 0x306   :  { %1228 = vsyncpa [#allocation5], 1 }

</bundles_post_ra>
